<compile_context>
chip_gen: v5e
topology: v5e:2x2
jax: 0.10.0
libtpu: 0.0.40
codegen_flags: <defaults>
</compile_context>

<pallas_src>
import jax
import jax.numpy as jnp
from jax import lax
from jax.experimental import pallas as pl
from jax.experimental.pallas import tpu as pltpu


def _pixel_shuffle_kernel(x_ref, g_ref, jb_ref, bm_ref, rt_ref, o_ref):
    # x_ref : (1, RRH, W)   one (n, oc) slab; row = c*H + h, col = w
    # g_ref : (W, WR)       G[w, b]   = 1.0 iff w == b // r    (lane expand)
    # jb_ref: (RRH, 1)      jb[c*H+h] = c % r                  (col offset j)
    # bm_ref: (1, WR)       bm[b]     = b % r
    # rt_ref: (1, RRH)      rt[c*H+h] = h*r + c // r           (target out row)
    # o_ref : (1, HR, WR)
    rrh = x_ref.shape[1]
    hr = o_ref.shape[1]

    x = x_ref[0].astype(jnp.float32)                                  # (RRH, W)

    # 1) lane expansion: xg[ch, b] = x[ch, b // r]
    xg = jnp.dot(x, g_ref[...], preferred_element_type=jnp.float32)   # (RRH, WR)

    # 2) keep only lanes whose column offset matches this channel's j
    keep = jb_ref[...] == bm_ref[...]                                  # (RRH, WR)
    y = jnp.where(keep, xg, 0.0)

    # 3) row scatter fused with the channel reduction: one K = RRH matmul.
    a_ids = lax.broadcasted_iota(jnp.int32, (hr, rrh), 0)
    r2 = (a_ids == rt_ref[...]).astype(jnp.float32)                    # (HR, RRH)
    out = jnp.dot(r2, y, preferred_element_type=jnp.float32)           # (HR, WR)

    o_ref[0] = out.astype(o_ref.dtype)


def decoder_forward(feats, depth=3):
    """Equivalent of Decoder(depth).forward(feats) for NCHW feats."""
    r = 2 ** depth
    rr = r * r
    N, C, H, W = feats.shape
    assert C % rr == 0, "channels must be divisible by (2**depth)**2"
    OC = C // rr
    NS = N * OC
    RRH, HR, WR = rr * H, H * r, W * r

    # Contiguous (free) view: one row per (channel, h), w on lanes.
    x = feats.reshape(NS, RRH, W)

    # Tiny O(n) index constants; the full one-hots are built in-kernel.
    w_idx = jnp.arange(W, dtype=jnp.int32)
    b_idx = jnp.arange(WR, dtype=jnp.int32)
    ch_idx = jnp.arange(RRH, dtype=jnp.int32)
    c_idx = ch_idx // H
    h_idx = ch_idx % H

    g = (w_idx[:, None] == b_idx[None, :] // r).astype(jnp.float32)    # (W, WR)
    jb = (c_idx % r)[:, None]                                          # (RRH, 1)
    bm = (b_idx % r)[None, :]                                          # (1, WR)
    rt = (h_idx * r + c_idx // r)[None, :]                             # (1, RRH)

    out = pl.pallas_call(
        _pixel_shuffle_kernel,
        out_shape=jax.ShapeDtypeStruct((NS, HR, WR), feats.dtype),
        grid_spec=pltpu.PrefetchScalarGridSpec(
            num_scalar_prefetch=0,
            grid=(NS,),
            in_specs=[
                pl.BlockSpec((1, RRH, W), lambda s: (s, 0, 0)),
                pl.BlockSpec((W, WR), lambda s: (0, 0)),
                pl.BlockSpec((RRH, 1), lambda s: (0, 0)),
                pl.BlockSpec((1, WR), lambda s: (0, 0)),
                pl.BlockSpec((1, RRH), lambda s: (0, 0)),
            ],
            out_specs=pl.BlockSpec((1, HR, WR), lambda s: (s, 0, 0)),
        ),
        compiler_params=pltpu.CompilerParams(
            dimension_semantics=("parallel",)),
    )(x, g, jb, bm, rt)

    # free (contiguous) view back to NCHW output
    return out.reshape(N, OC, HR, WR)


if __name__ == "__main__":
    key = jax.random.PRNGKey(0)
    depth = 3
    r = 2 ** depth
    N, C, H, W = 2, 128, 4, 4          # C must be a multiple of r*r = 64
    feats = jax.random.normal(key, (N, C, H, W), dtype=jnp.float32)

    out = decoder_forward(feats, depth=depth)
    out = jax.block_until_ready(out)

    # Pure-JAX reference (torch.nn.PixelShuffle semantics).
    OC = C // (r * r)
    ref = feats.reshape(N, OC, r, r, H, W).transpose(0, 1, 4, 2, 5, 3).reshape(
        N, OC, H * r, W * r)

    assert out.shape == (N, OC, H * r, W * r)
    assert out.dtype == feats.dtype
    assert jnp.allclose(out, ref, atol=1e-5, rtol=1e-5)
    print("KERNEL_OK")
</pallas_src>

<mosaic_0001>
module attributes {stable_mosaic.version = 11 : i64} {
  func.func @_pixel_shuffle_kernel(%arg0: i32, %arg1: memref<1x256x4xf32, #tpu.memory_space<vmem>>, %arg2: memref<4x32xf32, #tpu.memory_space<vmem>>, %arg3: memref<256x1xi32, #tpu.memory_space<vmem>>, %arg4: memref<1x32xi32, #tpu.memory_space<vmem>>, %arg5: memref<1x256xi32, #tpu.memory_space<vmem>>, %arg6: memref<1x32x32xf32, #tpu.memory_space<vmem>>) attributes {dimension_semantics = [#tpu.dimension_semantics<parallel>], iteration_bounds = array<i64: 4>, scalar_prefetch = 0 : i64, scratch_operands = 0 : i64, tpu.core_type = #tpu.core_type<tc>, window_params = [{transform_indices = @transform_0, window_bounds = array<i64: 1, 256, 4>}, {pipeline_mode = #tpu.pipeline_mode<synchronous>, transform_indices = @transform_1, window_bounds = array<i64: 4, 32>}, {pipeline_mode = #tpu.pipeline_mode<synchronous>, transform_indices = @transform_2, window_bounds = array<i64: 256, 1>}, {pipeline_mode = #tpu.pipeline_mode<synchronous>, transform_indices = @transform_3, window_bounds = array<i64: 1, 32>}, {pipeline_mode = #tpu.pipeline_mode<synchronous>, transform_indices = @transform_4, window_bounds = array<i64: 1, 256>}, {transform_indices = @transform_5, window_bounds = array<i64: 1, 32, 32>}]} {
    %c0 = arith.constant 0 : index
    %c0_0 = arith.constant 0 : index
    %c0_1 = arith.constant 0 : index
    %0 = vector.load %arg1[%c0, %c0_0, %c0_1] : memref<1x256x4xf32, #tpu.memory_space<vmem>>, vector<1x256x4xf32>
    %1 = vector.shape_cast %0 : vector<1x256x4xf32> to vector<256x4xf32>
    %c0_2 = arith.constant 0 : index
    %c0_3 = arith.constant 0 : index
    %2 = vector.load %arg2[%c0_2, %c0_3] : memref<4x32xf32, #tpu.memory_space<vmem>>, vector<4x32xf32>
    %cst = arith.constant dense<0.000000e+00> : vector<256x32xf32>
    %3 = tpu.matmul %1, %2, %cst {dimension_numbers = #tpu.dot_dimension_numbers<[1], [0], [0], [1], [0, 0, 1, 1], [], []>} : vector<256x4xf32>, vector<4x32xf32>, vector<256x32xf32> -> vector<256x32xf32>
    %c0_4 = arith.constant 0 : index
    %c0_5 = arith.constant 0 : index
    %4 = vector.load %arg3[%c0_4, %c0_5] : memref<256x1xi32, #tpu.memory_space<vmem>>, vector<256x1xi32>
    %c0_6 = arith.constant 0 : index
    %c0_7 = arith.constant 0 : index
    %5 = vector.load %arg4[%c0_6, %c0_7] : memref<1x32xi32, #tpu.memory_space<vmem>>, vector<1x32xi32>
    %6 = vector.broadcast %4 : vector<256x1xi32> to vector<256x32xi32>
    %7 = vector.broadcast %5 : vector<1x32xi32> to vector<256x32xi32>
    %8 = arith.cmpi eq, %6, %7 : vector<256x32xi32>
    %cst_8 = arith.constant 0.000000e+00 : f32
    %9 = vector.broadcast %cst_8 : f32 to vector<256x32xf32>
    %10 = arith.select %8, %3, %9 : vector<256x32xi1>, vector<256x32xf32>
    %11 = tpu.iota {dimensions = array<i32: 0>} : vector<32x256xi32>
    %c0_9 = arith.constant 0 : index
    %c0_10 = arith.constant 0 : index
    %12 = vector.load %arg5[%c0_9, %c0_10] : memref<1x256xi32, #tpu.memory_space<vmem>>, vector<1x256xi32>
    %13 = vector.broadcast %12 : vector<1x256xi32> to vector<32x256xi32>
    %14 = arith.cmpi eq, %11, %13 : vector<32x256xi32>
    %15 = arith.extui %14 : vector<32x256xi1> to vector<32x256xi32>
    %16 = arith.sitofp %15 : vector<32x256xi32> to vector<32x256xf32>
    %cst_11 = arith.constant dense<0.000000e+00> : vector<32x32xf32>
    %17 = tpu.matmul %16, %10, %cst_11 {dimension_numbers = #tpu.dot_dimension_numbers<[1], [0], [0], [1], [0, 0, 1, 1], [], []>} : vector<32x256xf32>, vector<256x32xf32>, vector<32x32xf32> -> vector<32x32xf32>
    %c0_12 = arith.constant 0 : index
    %c0_13 = arith.constant 0 : index
    %c0_14 = arith.constant 0 : index
    %18 = vector.load %arg6[%c0_12, %c0_13, %c0_14] : memref<1x32x32xf32, #tpu.memory_space<vmem>>, vector<1x32x32xf32>
    %19 = vector.shape_cast %18 : vector<1x32x32xf32> to vector<32x32xf32>
    %20 = vector.shape_cast %17 : vector<32x32xf32> to vector<1x32x32xf32>
    tpu.vector_store %arg6[%c0_12, %c0_13, %c0_14], %20 {strides = array<i32>} : memref<1x32x32xf32, #tpu.memory_space<vmem>>, vector<1x32x32xf32>,
    return
  }
  func.func @transform_0(%arg0: i32) -> (i32, i32, i32) {
    %c0_i32 = arith.constant 0 : i32
    %c0_i32_0 = arith.constant 0 : i32
    %c0_i32_1 = arith.constant 0 : i32
    return %arg0, %c0_i32, %c0_i32_0 : i32, i32, i32
  }
  func.func @transform_1(%arg0: i32) -> (i32, i32) {
    %c0_i32 = arith.constant 0 : i32
    %c0_i32_0 = arith.constant 0 : i32
    %c0_i32_1 = arith.constant 0 : i32
    return %c0_i32, %c0_i32_0 : i32, i32
  }
  func.func @transform_2(%arg0: i32) -> (i32, i32) {
    %c0_i32 = arith.constant 0 : i32
    %c0_i32_0 = arith.constant 0 : i32
    %c0_i32_1 = arith.constant 0 : i32
    return %c0_i32, %c0_i32_0 : i32, i32
  }
  func.func @transform_3(%arg0: i32) -> (i32, i32) {
    %c0_i32 = arith.constant 0 : i32
    %c0_i32_0 = arith.constant 0 : i32
    %c0_i32_1 = arith.constant 0 : i32
    return %c0_i32, %c0_i32_0 : i32, i32
  }
  func.func @transform_4(%arg0: i32) -> (i32, i32) {
    %c0_i32 = arith.constant 0 : i32
    %c0_i32_0 = arith.constant 0 : i32
    %c0_i32_1 = arith.constant 0 : i32
    return %c0_i32, %c0_i32_0 : i32, i32
  }
  func.func @transform_5(%arg0: i32) -> (i32, i32, i32) {
    %c0_i32 = arith.constant 0 : i32
    %c0_i32_0 = arith.constant 0 : i32
    %c0_i32_1 = arith.constant 0 : i32
    return %arg0, %c0_i32, %c0_i32_0 : i32, i32, i32
  }
}

</mosaic_0001>

<bundles_post_ra>
// kernel: tpu_custom_call.1
= control target key start
LH: loop header
LB: loop body
LE: loop exit
PB: predicated region body
PF: predicated region fallthrough
CT: control target
= control target key end

     0   :  { %10 = vsyncpa [#allocation3], 0  ;;  %s1456_s0 = inlined_call_operand.vmem [shape: f32[4,256,4], index: 0, kind: input, shape index: {}]   ;;  %s1457_s1 = inlined_call_operand.vmem [shape: f32[4,32], index: 1, kind: input, shape index: {}]   ;;  %s1458_s2 = inlined_call_operand.vmem [shape: s32[256,1], index: 2, kind: input, shape index: {}]   ;;  %s1459_s3 = inlined_call_operand.vmem [shape: s32[1,32], index: 3, kind: input, shape index: {}]   ;;  %s1460_s4 = inlined_call_operand.vmem [shape: s32[1,256], index: 4, kind: input, shape index: {}]   ;;  %s1461_s5 = inlined_call_operand.hbm [shape: f32[4,32,32], index: 5, kind: output, shape index: {}]  }
   0x1   :  { %12 = vsyncpa [#allocation3 + $0x1], 0  ;;  %s1080_s18 = smov 0   ;;  %s1082_s19 = smov 0  }
   0x2   :  { %s1084_s20 = smov 0   ;;  %s1086_s21 = smov 0  }
   0x3 LB: > { %s1101_s22 = sadd.s32 4294967295, %s1044_s21   ;;  %s837_s23 = sadd.s32 4294967294, %s1044_s21   ;;  %s1044_s21 = sphi %s1086_s21, %s1467_s21   ;;  %s1040_s20 = sphi %s1084_s20, %s1466_s20   ;;  %s1036_s19 = sphi %s1082_s19, %s1465_s19   ;;  %s1032_s18 = sphi %s1080_s18, %s1464_s18  }
   0x4   : > { %s1105_s24 = sadd.s32 1, %s1044_s21   ;;  %s135_s25 = sadd.s32 1, %s1040_s20 }
   0x5   : > { %s132_s26 = ssub.s32 %s1044_s21, %s1105_s24  ;;  %p145_p0 = scmp.ne.s32.totalorder %s1040_s20, %s1036_s19 }
   0x6   : > { %p133_p1 = scmp.eq.s32.totalorder %s132_s26, 0  ;;  %p146_p2 = scmp.eq.s32.totalorder %s1101_s22, 3 }
   0x7   : > { %p151_p3 = scmp.ne.s32.totalorder %s1036_s19, %s1032_s18  ;;  %p152_p4 = scmp.eq.s32.totalorder %s837_s23, 3 }
   0x8   : > { %s1116_s27 = scalar_select %p133_p1, %s1040_s20, %s135_s25  }
   0x9   : > { %p1118_p5 = por %p146_p2, %p145_p0  ;;  %p1122_p6 = por %p152_p4, %p151_p3 }
   0xa   : > { %p840_p7 = scmp.ge.s32.totalorder %s1044_s21, 1  ;;  %p190_p8 = scmp.lt.s32.totalorder %s1044_s21, 5 }
   0xc   : > { %p191_p9 = pnand %p840_p7, %p190_p8 }
   0xd   : > { %p218_p10 = scmp.lt.s32.totalorder (!%p191_p9), %s1101_s22, 3  ;;  %s215_s25 = sand.u32 (!%p191_p9), 1, %s1036_s19  }
   0xe   : > { %194 = sbr.rel (%p191_p9) target bundleno = 430 (0x1ae), region = 40  ;;  %s841_s26 = sshll.u32 (!%p191_p9), %s215_s25, 5 }
   0xf   : > { %s217_s30 = scalar_lea.vmem (!%p191_p9), [#allocation2], %s841_s26  ;;  %s931_s6 = sshll.u32 (!%p191_p9), %s1101_s22, 5 }
  0x10   : > { %s771_s9 = scalar_lea.hbm (!%p191_p9), %s1461_s5, %s931_s6  ;;  %s772_s10 = sshll.u32 (!%p191_p9), %s217_s30, 4  ;;  %s773_s10 = int_to_ptr.vmem [resolvable:$true] %s772_s10 }
  0x11   : > { %s774_s11 = sshll.u32 (!%p191_p9), %s771_s9, 4  ;;  %s760_s12 = scalar_lea.sflag (!%p191_p9), [#allocation3], %s215_s25  ;;  %s775_s11 = int_to_ptr.hbm [resolvable:$true] %s774_s11 }
  0x12   : > { %s1002_s15 = scalar_lea.hbm (!%p191_p9), %s1461_s5, 128 }
  0x13   : > { %v501_v0 = vld [vmem:[%s1458_s2 + $0xf8] sm:$0xff]  ;;  %v499_v1 = vld [vmem:[%s1458_s2 + $0xe8] sm:$0xff]  ;;  %v255_v2 = vld [vmem:[%s1457_s1] sm:$0xf]  ;;  %vm353_vm0 = vcmask 1043456   ;;  %v1046_v3 = vmov 0  }
  0x14   : > { %979 = vset.pattern.permute.xlu1 %v1046_v3  ;;  %978 = vset.pattern.permute.xlu0 %v1046_v3  ;;  %v498_v4 = vld [vmem:[%s1458_s2 + $0xe0] sm:$0xff]  ;;  %s219_s13 = scalar_select %p218_p10, %s1101_s22, 3  ;;  %vm256_vm1 = vcmask 31744   ;;  %v500_v5 = vld [vmem:[%s1458_s2 + $0xf0] sm:$0xff]  ;;  %v485_v8 = vld [vmem:[%s1458_s2 + $0x78] sm:$0xff] }
  0x15   : > { %597 = vperm.xlu0 %978, %v501_v0   ;;  %591 = vperm.xlu1 %979, %v499_v1   ;;  %v484_v10 = vld [vmem:[%s1458_s2 + $0x70] sm:$0xff]  ;;  %v497_v13 = vld [vmem:[%s1458_s2 + $0xd8] sm:$0xff]  ;;  %v483_v14 = vld [vmem:[%s1458_s2 + $0x68] sm:$0xff]  ;;  %s996_s22 = sshra.s32 %s775_s11, 4  ;;  %s997_s22 = int_to_ptr.hbm [resolvable:$true] %s996_s22 }
  0x16   : > { %844 = vmatpush.msk.msra.mxu0 %vm353_vm0, %v255_v2  ;;  %934 = vmatpush.msk.msra.mxu3 %vm353_vm0, %v255_v2  ;;  %s930_s14 = sshll.u32 %s219_s13, 8  ;;  %v496_v16 = vld [vmem:[%s1458_s2 + $0xd0] sm:$0xff]  ;;  %v495_v19 = vld [vmem:[%s1458_s2 + $0xc8] sm:$0xff]  ;;  %v482_v20 = vld [vmem:[%s1458_s2 + $0x60] sm:$0xff]  ;;  %s998_s13 = scalar_lea.hbm %s997_s22, 32 }
  0x17   : > { %980 = vset.pattern.permute.xlu2 %v1046_v3  ;;  %932 = vmatpush.msk.msra.mxu1 %vm353_vm0, %v255_v2  ;;  %s1149_s17 = scalar_lea.vmem %s1456_s0, %s930_s14  ;;  %v481_v22 = vld [vmem:[%s1458_s2 + $0x58] sm:$0xff]  ;;  %v494_v25 = vld [vmem:[%s1458_s2 + $0xc0] sm:$0xff]  ;;  %v480_v26 = vld [vmem:[%s1458_s2 + $0x50] sm:$0xff]  ;;  %p999_p11 = scmp.ne.s32.totalorder %s997_s22, %s998_s13 }
  0x18   : > { %588 = vperm.xlu2 %980, %v498_v4   ;;  %933 = vmatpush.msk.msra.mxu2 %vm353_vm0, %v255_v2  ;;  %v223_v6 = vld [vmem:[%s1149_s17] sm:$0xff]  ;;  %v244_v7 = vld [vmem:[%s1149_s17 + $0xa8] sm:$0xff]  ;;  %v245_v12 = vld [vmem:[%s1149_s17 + $0xb0] sm:$0xff]  ;;  %p1003_p0 = scmp.lt.s32.totalorder %s997_s22, %s1461_s5  ;;  %p1004_p1 = scmp.lt.s32.totalorder %s1002_s15, %s998_s13 }
  0x19   : > { %845 = vmatmul.msk.f32.vlgmr.msra.gmra.mxu0 %vm256_vm1, %v223_v6  ;;  %866 = vmatmul.msk.f32.vlgmr.msra.gmra.mxu3 %vm256_vm1, %v244_v7  ;;  %v235_v9 = vld [vmem:[%s1149_s17 + $0x60] sm:$0xff]  ;;  %v224_v11 = vld [vmem:[%s1149_s17 + $0x8] sm:$0xff]  ;;  %v225_v17 = vld [vmem:[%s1149_s17 + $0x10] sm:$0xff]  ;;  %p1000_p12 = pnand %p999_p11, %p1118_p5 }
  0x1a   : > { %857 = vmatmul.msk.f32.vlgmr.msra.gmra.mxu1 %vm256_vm1, %v235_v9  ;;  %v236_v15 = vld [vmem:[%s1149_s17 + $0x68] sm:$0xff]  ;;  %v246_v18 = vld [vmem:[%s1149_s17 + $0xb8] sm:$0xff]  ;;  %v237_v21 = vld [vmem:[%s1149_s17 + $0x70] sm:$0xff]  ;;  %p1005_p2 = por %p1004_p1, %p1003_p0 }
  0x1b   : > { %v226_v23 = vld [vmem:[%s1149_s17 + $0x18] sm:$0xff]  ;;  %v247_v24 = vld [vmem:[%s1149_s17 + $0xc0] sm:$0xff]  ;;  %v248_v30 = vld [vmem:[%s1149_s17 + $0xc8] sm:$0xff]  ;;  %p1001_p13 = pneg %p1000_p12 }
  0x1c   : > { %v238_v27 = vld [vmem:[%s1149_s17 + $0x78] sm:$0xff]  ;;  %v227_v29 = vld [vmem:[%s1149_s17 + $0x20] sm:$0xff]  ;;  %v492_v31 = vld [vmem:[%s1458_s2 + $0xb0] sm:$0xff] }
  0x1d   : > { %594 = vperm.xlu0 %978, %v500_v5   ;;  %549 = vperm.xlu1 %979, %v485_v8   ;;  %v493_v28 = vld [vmem:[%s1458_s2 + $0xb8] sm:$0xff]  ;;  %v479_v32 = vld [vmem:[%s1458_s2 + $0x48] sm:$0xff]  ;;  %v478_v33 = vld [vmem:[%s1458_s2 + $0x40] sm:$0xff]  ;;  %p1006_p3 = pnand %p1005_p2, %p1001_p13 }
  0x1e   : > { %v239_v34 = vld [vmem:[%s1149_s17 + $0x80] sm:$0xff]  ;;  %v228_v35 = vld [vmem:[%s1149_s17 + $0x28] sm:$0xff]  ;;  %v249_v36 = vld [vmem:[%s1149_s17 + $0xd0] sm:$0xff] }
  0x1f   : > { %861 = vmatmul.msk.f32.vlgmr.msra.gmra.mxu2 %vm256_vm1, %v239_v34  ;;  %v491_v37 = vld [vmem:[%s1458_s2 + $0xa8] sm:$0xff]  ;;  %v477_v38 = vld [vmem:[%s1458_s2 + $0x38] sm:$0xff]  ;;  %v490_v39 = vld [vmem:[%s1458_s2 + $0xa0] sm:$0xff] }
  0x20   : > { %546 = vperm.xlu2 %980, %v484_v10   ;;  %v240_v40 = vld [vmem:[%s1149_s17 + $0x88] sm:$0xff]  ;;  %v229_v41 = vld [vmem:[%s1149_s17 + $0x30] sm:$0xff]  ;;  %v250_v42 = vld [vmem:[%s1149_s17 + $0xd8] sm:$0xff] }
  0x21   : > { %846 = vmatmul.msk.f32.gmra.mxu0 %vm256_vm1, %v224_v11  ;;  %867 = vmatmul.msk.f32.gmra.mxu3 %vm256_vm1, %v245_v12  ;;  %v489_v43 = vld [vmem:[%s1458_s2 + $0x98] sm:$0xff]  ;;  %v476_v44 = vld [vmem:[%s1458_s2 + $0x30] sm:$0xff]  ;;  %v475_v46 = vld [vmem:[%s1458_s2 + $0x28] sm:$0xff] }
  0x22   : > { %858 = vmatmul.msk.f32.gmra.mxu1 %vm256_vm1, %v236_v15  ;;  %v241_v45 = vld [vmem:[%s1149_s17 + $0x90] sm:$0xff]  ;;  %v230_v47 = vld [vmem:[%s1149_s17 + $0x38] sm:$0xff]  ;;  %v251_v48 = vld [vmem:[%s1149_s17 + $0xe0] sm:$0xff] }
  0x23   : > { %v488_v49 = vld [vmem:[%s1458_s2 + $0x90] sm:$0xff]  ;;  %v474_v50 = vld [vmem:[%s1458_s2 + $0x20] sm:$0xff]  ;;  %v242_v51 = vld [vmem:[%s1149_s17 + $0x98] sm:$0xff] }
  0x24   : > { %v487_v52 = vld [vmem:[%s1458_s2 + $0x88] sm:$0xff]  ;;  %v231_v53 = vld [vmem:[%s1149_s17 + $0x40] sm:$0xff]  ;;  %v473_v56 = vld [vmem:[%s1458_s2 + $0x18] sm:$0xff] }
  0x25   : > { %585 = vperm.xlu0 %978, %v497_v13   ;;  %543 = vperm.xlu1 %979, %v483_v14   ;;  %v252_v54 = vld [vmem:[%s1149_s17 + $0xe8] sm:$0xff]  ;;  %v486_v55 = vld [vmem:[%s1458_s2 + $0x80] sm:$0xff]  ;;  %v472_v58 = vld [vmem:[%s1458_s2 + $0x10] sm:$0xff] }
  0x26   : > { %v243_v57 = vld [vmem:[%s1149_s17 + $0xa0] sm:$0xff]  ;;  %v232_v59 = vld [vmem:[%s1149_s17 + $0x48] sm:$0xff]  ;;  %v253_v60 = vld [vmem:[%s1149_s17 + $0xf0] sm:$0xff] }
  0x27   : > { %862 = vmatmul.msk.f32.gmra.mxu2 %vm256_vm1, %v240_v40  ;;  %v471_v61 = vld [vmem:[%s1458_s2 + $0x8] sm:$0xff]  ;;  %v470_v62 = vld [vmem:[%s1458_s2] sm:$0xff]  ;;  %v233_v63 = vld [vmem:[%s1149_s17 + $0x50] sm:$0xff] }
  0x28   : > { %582 = vperm.xlu2 %980, %v496_v16   ;;  %v254_v0 = vld [vmem:[%s1149_s17 + $0xf8] sm:$0xff]  ;;  %v1325_v16 = vld [vmem:[%s1459_s3] ss:$0 sm:$0xff] }
  0x29   : > { %847 = vmatmul.msk.f32.gmra.mxu0 %vm256_vm1, %v225_v17  ;;  %868 = vmatmul.msk.f32.gmra.mxu3 %vm256_vm1, %v246_v18  ;;  %v234_v1 = vld [vmem:[%s1149_s17 + $0x58] sm:$0xff] }
  0x2a   : > { %859 = vmatmul.msk.f32.gmra.mxu1 %vm256_vm1, %v237_v21 }
  0x2d   : > { %579 = vperm.xlu1 %979, %v495_v19   ;;  %540 = vperm.xlu0 %978, %v482_v20  }
  0x2f   : > { %863 = vmatmul.msk.f32.gmra.mxu2 %vm256_vm1, %v241_v45 }
  0x30   : > { %537 = vperm.xlu2 %980, %v481_v22  }
  0x31   : > { %848 = vmatmul.msk.f32.gmra.mxu0 %vm256_vm1, %v226_v23  ;;  %869 = vmatmul.msk.f32.gmra.mxu3 %vm256_vm1, %v247_v24 }
  0x32   : > { %860 = vmatmul.msk.f32.gmra.mxu1 %vm256_vm1, %v238_v27 }
  0x35   : > { %576 = vperm.xlu0 %978, %v494_v25   ;;  %534 = vperm.xlu1 %979, %v480_v26  }
  0x37   : > { %864 = vmatmul.msk.f32.gmra.mxu2 %vm256_vm1, %v242_v51 }
  0x38   : > { %573 = vperm.xlu2 %980, %v493_v28  }
  0x39   : > { %849 = vmatmul.msk.f32.gmra.mxu0 %vm256_vm1, %v227_v29  ;;  %870 = vmatmul.msk.f32.gmra.mxu3 %vm256_vm1, %v248_v30 }
  0x3d   : > { %570 = vperm.xlu1 %979, %v492_v31   ;;  %531 = vperm.xlu0 %978, %v479_v32  }
  0x3f   : > { %865 = vmatmul.msk.f32.gmra.mxu2 %vm256_vm1, %v243_v57 }
  0x40   : > { %528 = vperm.xlu2 %980, %v478_v33  }
  0x41   : > { %850 = vmatmul.msk.f32.gmra.mxu0 %vm256_vm1, %v228_v35  ;;  %871 = vmatmul.msk.f32.gmra.mxu3 %vm256_vm1, %v249_v36 }
  0x45   : > { %567 = vperm.xlu0 %978, %v491_v37   ;;  %525 = vperm.xlu1 %979, %v477_v38  }
  0x48   : > { %564 = vperm.xlu2 %980, %v490_v39  }
  0x49   : > { %851 = vmatmul.msk.f32.gmra.mxu0 %vm256_vm1, %v229_v41  ;;  %872 = vmatmul.msk.f32.gmra.mxu3 %vm256_vm1, %v250_v42 }
  0x4d   : > { %561 = vperm.xlu1 %979, %v489_v43   ;;  %522 = vperm.xlu0 %978, %v476_v44  }
  0x50   : > { %519 = vperm.xlu2 %980, %v475_v46  }
  0x51   : > { %852 = vmatmul.msk.f32.gmra.mxu0 %vm256_vm1, %v230_v47  ;;  %873 = vmatmul.msk.f32.gmra.mxu3 %vm256_vm1, %v251_v48 }
  0x55   : > { %558 = vperm.xlu0 %978, %v488_v49   ;;  %516 = vperm.xlu1 %979, %v474_v50  }
  0x58   : > { %555 = vperm.xlu2 %980, %v487_v52  }
  0x59   : > { %853 = vmatmul.msk.f32.gmra.mxu0 %vm256_vm1, %v231_v53  ;;  %874 = vmatmul.msk.f32.gmra.mxu3 %vm256_vm1, %v252_v54 }
  0x5d   : > { %552 = vperm.xlu1 %979, %v486_v55   ;;  %513 = vperm.xlu0 %978, %v473_v56  }
  0x60   : > { %510 = vperm.xlu2 %980, %v472_v58  }
  0x61   : > { %854 = vmatmul.msk.f32.gmra.mxu0 %vm256_vm1, %v232_v59  ;;  %875 = vmatmul.msk.f32.gmra.mxu3 %vm256_vm1, %v253_v60 }
  0x65   : > { %507 = vperm.xlu0 %978, %v471_v61   ;;  %504 = vperm.xlu1 %979, %v470_v62  }
  0x69   : > { %855 = vmatmul.msk.f32.gmra.mxu0 %vm256_vm1, %v233_v63  ;;  %876 = vmatmul.msk.f32.gmra.mxu3 %vm256_vm1, %v254_v0  ;;  %v664_v0 = vlaneseq }
  0x71   : > { %856 = vmatmul.msk.f32.gmra.mxu0 %vm256_vm1, %v234_v1  ;;  %v669_v1 = vld [vmem:[%s1460_s4] sm:$0x3] }
  0x72   : > { %v1314_v10 = vpop.permute.xlu2 %588 }
  0x73   : > { %vm628_vm11 = vcmp.eq.s32.totalorder %v1314_v10, %v1325_v16  ;;  %v671_v10 = vperm.slane %v669_v1, 1 }
  0x7a   : > { %v547_v18 = vpop.permute.xlu2 %546 }
  0x7b   : > { %vm614_vm3 = vcmp.eq.s32.totalorder %v547_v18, %v1325_v16 }
  0x82   : > { %v583_v25 = vpop.permute.xlu2 %582 }
  0x83   : > { %vm626_vm15 = vcmp.eq.s32.totalorder %v583_v25, %v1325_v16 }
  0x87   : > { %v1302_v2 = vpop.permute.xlu0 %597  ;;  %v1308_v6 = vpop.permute.xlu1 %591 }
  0x88   : > { %vm631_vm6 = vcmp.eq.s32.totalorder %v1302_v2, %v1325_v16  ;;  %vm629_vm9 = vcmp.eq.s32.totalorder %v1308_v6, %v1325_v16 }
  0x8a   : > { %v538_v29 = vpop.permute.xlu2 %537 }
  0x8b   : > { %vm611_vm8 = vcmp.eq.s32.totalorder %v538_v29, %v1325_v16 }
  0x8f   : > { %v1312_v8 = vpop.permute.xlu0 %594  ;;  %v550_v13 = vpop.permute.xlu1 %549 }
  0x90   : > { %vm615_vm2 = vcmp.eq.s32.totalorder %v550_v13, %v1325_v16  ;;  %vm630_vm7 = vcmp.eq.s32.totalorder %v1312_v8, %v1325_v16 }
  0x92   : > { %v1345_v34 = vpop.permute.xlu2 %573 }
  0x96   : > { %v1304_v3 = vpop.f32.mrf.mxu0 }
  0x97   : > { %v410_v4 = vpop.f32.mrf.mxu1  ;;  %v1320_v15 = vpop.permute.xlu0 %585 }
  0x98   : > { %v544_v20 = vpop.permute.xlu1 %543  ;;  %vm627_vm13 = vcmp.eq.s32.totalorder %v1320_v15, %v1325_v16 }
  0x99   : > { %vm613_vm4 = vcmp.eq.s32.totalorder %v544_v20, %v1325_v16 }
  0x9a   : > { %v529_v40 = vpop.permute.xlu2 %528 }
  0x9b   : > { %vm608_vm14 = vcmp.eq.s32.totalorder %v529_v40, %v1325_v16 }
  0x9c   : > { %v1306_v5 = vpop.f32.mrf.mxu3 }
  0x9e   : > { %v1310_v7 = vpop.f32.mrf.mxu0 }
  0x9f   : > { %v413_v9 = vpop.f32.mrf.mxu1  ;;  %v541_v22 = vpop.permute.xlu0 %540 }
  0xa0   : > { %vm612_vm5 = vcmp.eq.s32.totalorder %v541_v22, %v1325_v16  ;;  %v1339_v26 = vpop.permute.xlu1 %579 }
  0xa1   : > { %vm625_vm1 = vcmp.eq.s32.totalorder %v1339_v26, %v1325_v16 }
  0xa2   : > { %v1351_v43 = vpop.f32.mrf.mxu2  ;;  %v1353_v47 = vpop.permute.xlu2 %564 }
  0xa4   : > { %v1316_v11 = vpop.f32.mrf.mxu3 }
  0xa6   : > { %v1318_v12 = vpop.f32.mrf.mxu0 }
  0xa7   : > { %v416_v14 = vpop.f32.mrf.mxu1  ;;  %v1343_v30 = vpop.permute.xlu0 %576 }
  0xa8   : > { %v535_v32 = vpop.permute.xlu1 %534 }
  0xa9   : > { %vm610_vm10 = vcmp.eq.s32.totalorder %v535_v32, %v1325_v16 }
  0xaa   : > { %v1355_v49 = vpop.f32.mrf.mxu2  ;;  %v520_v53 = vpop.permute.xlu2 %519 }
  0xac   : > { %v1327_v17 = vpop.f32.mrf.mxu3 }
  0xae   : > { %v1329_v19 = vpop.f32.mrf.mxu0 }
  0xaf   : > { %v419_v21 = vpop.f32.mrf.mxu1  ;;  %v532_v36 = vpop.permute.xlu0 %531 }
  0xb0   : > { %885 = vmatpush.msk.msrb.mxu1 %vm615_vm2, %v419_v21  ;;  %v1347_v38 = vpop.permute.xlu1 %570  ;;  %vm609_vm12 = vcmp.eq.s32.totalorder %v532_v36, %v1325_v16 }
  0xb2   : > { %886 = vmatpush.msk.msrb.mxu1 %vm614_vm3, %v416_v14  ;;  %v1363_v56 = vpop.f32.mrf.mxu2  ;;  %v556_v59 = vpop.permute.xlu2 %555  ;;  %vm624_vm3 = vcmp.eq.s32.totalorder %v1343_v30, %v1325_v16 }
  0xb4   : > { %v1334_v23 = vpop.f32.mrf.mxu3  ;;  %887 = vmatpush.msk.msrb.mxu1 %vm613_vm4, %v413_v9  ;;  %vm605_vm4 = vcmp.eq.s32.totalorder %v520_v53, %v1325_v16  ;;  %v665_v9 = vshrl.u32 %v664_v0, 7 }
  0xb6   : > { %v1337_v24 = vpop.f32.mrf.mxu0  ;;  %888 = vmatpush.msk.msrb.mxu1 %vm612_vm5, %v410_v4  ;;  %vm623_vm5 = vcmp.eq.s32.totalorder %v1345_v34, %v1325_v16  ;;  %v670_v4 = vperm.slane %v669_v1, 0 }
  0xb7   : > { %v1349_v42 = vpop.permute.xlu0 %567 }
  0xb8   : > { %v526_v44 = vpop.permute.xlu1 %525 }
  0xb9   : > { %vm607_vm0 = vcmp.eq.s32.totalorder %v526_v44, %v1325_v16 }
  0xba   : > { %v431_v61 = vpop.f32.mrf.mxu2  ;;  %v511_v63 = vpop.permute.xlu2 %510 }
  0xbc   : > { %v449_v27 = vpop.f32.mrf.mxu3 }
  0xbe   : > { %v1341_v28 = vpop.f32.mrf.mxu0 }
  0xbf   : > { %v523_v48 = vpop.permute.xlu0 %522 }
  0xc0   : > { %v1357_v50 = vpop.permute.xlu1 %561  ;;  %vm606_vm2 = vcmp.eq.s32.totalorder %v523_v48, %v1325_v16 }
  0xc2   : > { %v434_v6 = vpop.f32.mrf.mxu2 }
  0xc4   : > { %v452_v31 = vpop.f32.mrf.mxu3 }
  0xc6   : > { %v392_v33 = vpop.f32.mrf.mxu0 }
  0xc7   : > { %v1359_v54 = vpop.permute.xlu0 %558 }
  0xc8   : > { %v517_v57 = vpop.permute.xlu1 %516 }
  0xcc   : > { %v455_v35 = vpop.f32.mrf.mxu3 }
  0xce   : > { %v395_v37 = vpop.f32.mrf.mxu0 }
  0xcf   : > { %v514_v60 = vpop.permute.xlu0 %513 }
  0xd0   : > { %v553_v62 = vpop.permute.xlu1 %552 }
  0xd4   : > { %v458_v39 = vpop.f32.mrf.mxu3 }
  0xd6   : > { %v398_v41 = vpop.f32.mrf.mxu0 }
  0xd7   : > { %v508_v2 = vpop.permute.xlu0 %507 }
  0xd8   : > { %v505_v8 = vpop.permute.xlu1 %504 }
  0xdc   : > { %v461_v45 = vpop.f32.mrf.mxu3 }
  0xde   : > { %v401_v46 = vpop.f32.mrf.mxu0 }
  0xe4   : > { %v464_v51 = vpop.f32.mrf.mxu3 }
  0xe6   : > { %v404_v52 = vpop.f32.mrf.mxu0 }
  0xec   : > { %v467_v55 = vpop.f32.mrf.mxu3 }
  0xed   : > { %905 = vmatpush.msk.msrb.mxu2 %vm631_vm6, %v467_v55  ;;  %vm604_vm6 = vcmp.eq.s32.totalorder %v517_v57, %v1325_v16 }
  0xee   : > { %v407_v58 = vpop.f32.mrf.mxu0 }
  0xef   : > { %889 = vmatpush.msk.msrb.mxu1 %vm611_vm8, %v407_v58  ;;  %906 = vmatpush.msk.msrb.mxu2 %vm630_vm7, %v464_v51  ;;  %vm622_vm7 = vcmp.eq.s32.totalorder %v1347_v38, %v1325_v16  ;;  %vm603_vm8 = vcmp.eq.s32.totalorder %v514_v60, %v1325_v16 }
  0xf1   : > { %890 = vmatpush.msk.msrb.mxu1 %vm610_vm10, %v404_v52  ;;  %907 = vmatpush.msk.msrb.mxu2 %vm629_vm9, %v461_v45  ;;  %vm621_vm9 = vcmp.eq.s32.totalorder %v1349_v42, %v1325_v16  ;;  %vm602_vm10 = vcmp.eq.s32.totalorder %v511_v63, %v1325_v16 }
  0xf3   : > { %891 = vmatpush.msk.msrb.mxu1 %vm609_vm12, %v401_v46  ;;  %908 = vmatpush.msk.msrb.mxu2 %vm628_vm11, %v458_v39  ;;  %vm620_vm11 = vcmp.eq.s32.totalorder %v1353_v47, %v1325_v16  ;;  %vm601_vm12 = vcmp.eq.s32.totalorder %v508_v2, %v1325_v16 }
  0xf5   : > { %892 = vmatpush.msk.msrb.mxu1 %vm608_vm14, %v398_v41  ;;  %909 = vmatpush.msk.msrb.mxu2 %vm627_vm13, %v455_v35  ;;  %vm672_vm13 = vcmp.eq.s32.totalorder %v665_v9, %v670_v4  ;;  %vm619_vm14 = vcmp.eq.s32.totalorder %v1357_v50, %v1325_v16 }
  0xf7   : > { %893 = vmatpush.msk.msrb.mxu1 %vm607_vm0, %v395_v37  ;;  %910 = vmatpush.msk.msrb.mxu2 %vm626_vm15, %v452_v31  ;;  %vm600_vm15 = vcmp.eq.s32.totalorder %v505_v8, %v1325_v16  ;;  %vm618_vm0 = vcmp.eq.s32.totalorder %v1359_v54, %v1325_v16 }
  0xf9   : > { %894 = vmatpush.msk.msrb.mxu1 %vm606_vm2, %v392_v33  ;;  %911 = vmatpush.msk.msrb.mxu2 %vm625_vm1, %v449_v27  ;;  %vm617_vm1 = vcmp.eq.s32.totalorder %v556_v59, %v1325_v16  ;;  %vm673_vm2 = vcmp.eq.s32.totalorder %v665_v9, %v671_v10 }
  0xfb   : > { %895 = vmatpush.msk.msrb.mxu1 %vm605_vm4, %v1341_v28  ;;  %912 = vmatpush.msk.msrb.mxu2 %vm624_vm3, %v1334_v23  ;;  %vm616_vm3 = vcmp.eq.s32.totalorder %v553_v62, %v1325_v16 }
  0xfd   : > { %896 = vmatpush.msk.msrb.mxu1 %vm604_vm6, %v1337_v24  ;;  %913 = vmatpush.msk.msrb.mxu2 %vm623_vm5, %v1327_v17 }
  0xff   : > { %897 = vmatpush.msk.msrb.mxu1 %vm603_vm8, %v1329_v19  ;;  %914 = vmatpush.msk.msrb.mxu2 %vm622_vm7, %v1316_v11  ;;  %v668_v11 = vadd.s32 24, %v665_v9 }
 0x101   : > { %898 = vmatpush.msk.msrb.mxu1 %vm602_vm10, %v1318_v12  ;;  %915 = vmatpush.msk.msrb.mxu2 %vm621_vm9, %v1306_v5  ;;  %v1047_v5 = vmov 1.0   ;;  %vm678_vm8 = vcmp.eq.s32.totalorder %v668_v11, %v670_v4  ;;  %vm679_vm9 = vcmp.eq.s32.totalorder %v668_v11, %v671_v10  ;;  %vm754_vm10 = vcmask 261120  }
 0x103   : > { %899 = vmatpush.msk.msrb.mxu1 %vm601_vm12, %v1310_v7  ;;  %916 = vmatpush.msk.msrb.mxu2 %vm620_vm11, %v434_v6  ;;  %v666_v7 = vadd.s32 8, %v665_v9 }
 0x105   : > { %900 = vmatpush.msk.msrb.mxu1 %vm600_vm15, %v1304_v3  ;;  %917 = vmatpush.msk.msrb.mxu2 %vm619_vm14, %v431_v61  ;;  %vm674_vm4 = vcmp.eq.s32.totalorder %v666_v7, %v670_v4  ;;  %vm675_vm5 = vcmp.eq.s32.totalorder %v666_v7, %v671_v10  ;;  %v667_v3 = vadd.s32 16, %v665_v9 }
 0x106   : > { %901 = vmatmul.msk.f32.vlgmr.msrb.gmra.mxu1 %vm672_vm13, %v1047_v5 }
 0x107   : > { %918 = vmatpush.msk.msrb.mxu2 %vm618_vm0, %v1363_v56  ;;  %vm676_vm6 = vcmp.eq.s32.totalorder %v667_v3, %v670_v4  ;;  %vm677_vm7 = vcmp.eq.s32.totalorder %v667_v3, %v671_v10 }
 0x109   : > { %919 = vmatpush.msk.msrb.mxu2 %vm617_vm1, %v1355_v49 }
 0x10b   : > { %920 = vmatpush.msk.msrb.mxu2 %vm616_vm3, %v1351_v43 }
 0x10c   : > { %921 = vmatmul.msk.f32.vlgmr.msrb.gmra.mxu2 %vm673_vm2, %v1047_v5 }
 0x10e   : > { %902 = vmatmul.msk.f32.gmra.mxu1 %vm674_vm4, %v1047_v5 }
 0x114   : > { %922 = vmatmul.msk.f32.gmra.mxu2 %vm675_vm5, %v1047_v5 }
 0x116   : > { %903 = vmatmul.msk.f32.gmra.mxu1 %vm676_vm6, %v1047_v5 }
 0x11c   : > { %923 = vmatmul.msk.f32.gmra.mxu2 %vm677_vm7, %v1047_v5 }
 0x11e   : > { %904 = vmatmul.msk.f32.gmra.mxu1 %vm678_vm8, %v1047_v5 }
 0x124   : > { %924 = vmatmul.msk.f32.gmra.mxu2 %vm679_vm9, %v1047_v5 }
 0x183   : > { %v713_v12 = vpop.f32.mrf.mxu1 }
 0x18b   : > { %v716_v15 = vpop.f32.mrf.mxu1 }
 0x18f   : > { %v742_v13 = vpop.f32.mrf.mxu2 }
 0x190   : > { %v743_v14 = vadd.f32 %v742_v13, %v713_v12 }
 0x192   : > { %755 = vst.msk [vmem:[%s217_s30] sm:$0xff] %vm754_vm10, %v743_v14 }
 0x193   : > { %v719_v18 = vpop.f32.mrf.mxu1 }
 0x197   : > { %v745_v16 = vpop.f32.mrf.mxu2 }
 0x198   : > { %v746_v17 = vadd.f32 %v745_v16, %v716_v15 }
 0x19a   : > { %756 = vst.msk [vmem:[%s217_s30 + $0x8] sm:$0xff] %vm754_vm10, %v746_v17 }
 0x19b   : > { %v722_v21 = vpop.f32.mrf.mxu1 }
 0x19f   : > { %v748_v19 = vpop.f32.mrf.mxu2 }
 0x1a0   : > { %v749_v20 = vadd.f32 %v748_v19, %v719_v18 }
 0x1a2   : > { %757 = vst.msk [vmem:[%s217_s30 + $0x10] sm:$0xff] %vm754_vm10, %v749_v20 }
 0x1a7   : > { %v751_v22 = vpop.f32.mrf.mxu2 }
 0x1a8   : > { %v752_v23 = vadd.f32 %v751_v22, %v722_v21 }
 0x1aa   : > { %758 = vst.msk [vmem:[%s217_s30 + $0x18] sm:$0xff] %vm754_vm10, %v752_v23 }
 0x1ab   : > { %1009 = shalt.err (!%p1006_p3)
}
 0x1ac   : > { %s1048_s25 = smov 128   ;;  %s1049_s26 = smov 8  }
 0x1ad   : > { %935 = dma.vmem_to_hbm [thread:$0]  (%p1118_p5), %s773_s10, 512, %s775_s11, %s760_s12, %s1048_s25, %s1048_s25, %s1049_s26  }
 0x1ae PF: > { %p941_p4 = scmp.ge.s32.totalorder %s1044_s21, 2  ;;  %s789_s30 = sand.u32 1, %s1032_s18  }
 0x1af   : > { %s790_s6 = scalar_lea.sflag [#allocation3], %s789_s30 }
 0x1b0   : > { %p938_p7 = pnand %p941_p4, %p1122_p6 }
 0x1b2   : > { %p939_p8 = pneg %p938_p7 }
 0x1b4   : > { %1027 = dma.done.wait (%p939_p8), %s790_s6, 512  }
 0x1b5   : > { %1029 = vsyncadd (%p939_p8), %s790_s6, 4294966784  ;;  %p15_p9 = scmp.ge.s32.totalorder %s1105_s24, 6   ;;  %s1464_s18 = smov %s1036_s19 }
 0x1b6   : > { %s1465_s19 = smov %s1040_s20  ;;  %s1466_s20 = smov %s1116_s27 }
 0x1b7   : > { %s1467_s21 = smov %s1105_s24  ;;  %17 = sbr.rel (!%p15_p9) target bundleno = 3 (0x3), region = 75 }
 0x1bc   :  { %796 = vsyncpa [#allocation3], 1 }
 0x1bd   :  { %798 = vsyncpa [#allocation3 + $0x1], 1 }

</bundles_post_ra>
